<compile_context>
chip_gen: v5e
topology: v5e:2x2
jax: 0.10.0
libtpu: 0.0.40
codegen_flags: <defaults>
</compile_context>

<pallas_src>
import jax
import jax.numpy as jnp
from jax.experimental import pallas as pl
from jax.experimental.pallas import tpu as pltpu


def _make_convt_leaky_kernel(Cout, KH, KW, Ho, Wo, neg_slope):
    neg_slope = float(neg_slope)  # Python scalar -> folded into the mul, not a captured const

    def kernel(x_ref, w_ref, o_ref):
        # x_ref: (N, H, W)            f32 in VMEM   (Cin=1 squeezed in the wrapper)
        # w_ref: (Cout*KH*KW,)        f32 in SMEM   (flattened PyTorch (1, Cout, KH, KW))
        # o_ref: (N, Cout, Ho, Wo)    f32 in VMEM

        # Hoist all Cout*KH*KW scalar weight loads out of the vector work.
        # Spatial flip of the transposed-conv kernel is baked into the index.
        w = [[w_ref[co * KH * KW + (KH - 1 - kh) * KW + (KW - 1 - kw)]
              for kh in range(KH) for kw in range(KW)]
             for co in range(Cout)]

        # The 9 shifted input patches, computed once and reused for every Cout.
        # Pure sublane/lane windows (N untouched).
        patches = [x_ref[:, kh:kh + Ho, kw:kw + Wo]          # (N, Ho, Wo)
                   for kh in range(KH) for kw in range(KW)]

        # 9-tap weighted sum per output channel (pure VPU), leaky-negate fused,
        # direct per-channel store (no jnp.stack relayout).
        for co in range(Cout):
            acc = patches[0] * w[co][0]
            for t in range(1, KH * KW):
                acc = acc + patches[t] * w[co][t]
            o_ref[:, co, :, :] = jnp.where(acc > 0, acc, acc * neg_slope)

    return kernel


def model_forward(x, weight):
    """x: (N, 1, H, W) f32; weight: (1, Cout, KH, KW) f32 (PyTorch ConvTranspose2d layout).

    Returns (N, Cout, H-KH+1, W-KW+1) f32 — ConvTranspose2d(stride=1, padding=k-1)
    followed by where(y>0, y, -1.403*y).  F.interpolate(scale_factor=[1,1], 'nearest')
    is the identity.
    """
    N, Cin, H, W = x.shape
    Cin_w, Cout, KH, KW = weight.shape
    assert Cin == 1 and Cin_w == 1, "ConvTranspose2d was built with in_channels=1"
    # The valid-correlation-with-flipped-kernel identity only holds for stride=1, padding=k-1.
    stride, padding = 1, 2
    assert stride == 1 and padding == KH - 1 and padding == KW - 1, \
        "kernel assumes ConvTranspose2d(stride=1, padding=k-1)"
    Ho, Wo = H - KH + 1, W - KW + 1

    x_sq = x.reshape(N, H, W)      # squeeze Cin=1 in the wrapper (free relayout-wise)
    w_flat = weight.reshape(-1)    # 1-D SMEM: ~128 B instead of a 2-D (8,128)-word pad-out

    flops = 2 * N * Cout * Ho * Wo * KH * KW
    bytes_accessed = (x_sq.size + w_flat.size + N * Cout * Ho * Wo) * 4

    out = pl.pallas_call(
        _make_convt_leaky_kernel(Cout, KH, KW, Ho, Wo, -1.403),
        out_shape=jax.ShapeDtypeStruct((N, Cout, Ho, Wo), jnp.float32),
        in_specs=[
            pl.BlockSpec(memory_space=pltpu.MemorySpace.VMEM),   # x: whole array in VMEM
            pl.BlockSpec(memory_space=pltpu.MemorySpace.SMEM),   # weight: 27 scalars in SMEM
        ],
        out_specs=pl.BlockSpec(memory_space=pltpu.MemorySpace.VMEM),
        cost_estimate=pl.CostEstimate(flops=flops, transcendentals=0,
                                      bytes_accessed=bytes_accessed),
    )(x_sq, w_flat)

    # F.interpolate(x4, scale_factor=[1.0, 1.0]) with default 'nearest' mode is the identity.
    return out


def _reference(x, weight):
    """Pure-JAX reference (no Pallas) for correctness checking."""
    N, _, H, W = x.shape
    _, Cout, KH, KW = weight.shape
    Ho, Wo = H - KH + 1, W - KW + 1
    wf = weight[0, :, ::-1, ::-1]                                # (Cout, KH, KW), flipped
    out = jnp.zeros((N, Cout, Ho, Wo), jnp.float32)
    for kh in range(KH):
        for kw in range(KW):
            out = out + x[:, :, kh:kh + Ho, kw:kw + Wo] * wf[None, :, kh, kw][..., None, None]
    return jnp.where(out > 0, out, out * (-1.403))


if __name__ == "__main__":
    key = jax.random.PRNGKey(0)
    kx, kw = jax.random.split(key)

    # Small shapes consistent with the module (in_channels must be 1).
    # NOTE: the original script feeds (4, 3, 9, 8) into in_channels=1, which raises in
    # PyTorch (jit_fail case); we use an input consistent with the module: (N, 1, H, W).
    x = jax.random.normal(kx, (2, 1, 9, 8), dtype=jnp.float32)
    weight = jax.random.normal(kw, (1, 3, 3, 3), dtype=jnp.float32) * 0.3

    y = model_forward(x, weight)
    jax.block_until_ready(y)

    assert y.shape == (2, 3, 7, 6), y.shape
    y_ref = _reference(x, weight)
    assert jnp.allclose(y, y_ref, atol=1e-4, rtol=1e-4), "mismatch vs pure-JAX reference"
    print("KERNEL_OK")
</pallas_src>

<mosaic_0001>
module attributes {stable_mosaic.version = 11 : i64} {
  func.func @kernel(%arg0: memref<2x9x8xf32, #tpu.memory_space<vmem>>, %arg1: memref<27xf32, #tpu.memory_space<smem>>, %arg2: memref<2x3x7x6xf32, #tpu.memory_space<vmem>>) attributes {dimension_semantics = [], scalar_prefetch = 0 : i64, scratch_operands = 0 : i64, tpu.core_type = #tpu.core_type<tc>} {
    %c8 = arith.constant 8 : index
    %0 = memref.load %arg1[%c8] : memref<27xf32, #tpu.memory_space<smem>>
    %c7 = arith.constant 7 : index
    %1 = memref.load %arg1[%c7] : memref<27xf32, #tpu.memory_space<smem>>
    %c6 = arith.constant 6 : index
    %2 = memref.load %arg1[%c6] : memref<27xf32, #tpu.memory_space<smem>>
    %c5 = arith.constant 5 : index
    %3 = memref.load %arg1[%c5] : memref<27xf32, #tpu.memory_space<smem>>
    %c4 = arith.constant 4 : index
    %4 = memref.load %arg1[%c4] : memref<27xf32, #tpu.memory_space<smem>>
    %c3 = arith.constant 3 : index
    %5 = memref.load %arg1[%c3] : memref<27xf32, #tpu.memory_space<smem>>
    %c2 = arith.constant 2 : index
    %6 = memref.load %arg1[%c2] : memref<27xf32, #tpu.memory_space<smem>>
    %c1 = arith.constant 1 : index
    %7 = memref.load %arg1[%c1] : memref<27xf32, #tpu.memory_space<smem>>
    %c0 = arith.constant 0 : index
    %8 = memref.load %arg1[%c0] : memref<27xf32, #tpu.memory_space<smem>>
    %c17 = arith.constant 17 : index
    %9 = memref.load %arg1[%c17] : memref<27xf32, #tpu.memory_space<smem>>
    %c16 = arith.constant 16 : index
    %10 = memref.load %arg1[%c16] : memref<27xf32, #tpu.memory_space<smem>>
    %c15 = arith.constant 15 : index
    %11 = memref.load %arg1[%c15] : memref<27xf32, #tpu.memory_space<smem>>
    %c14 = arith.constant 14 : index
    %12 = memref.load %arg1[%c14] : memref<27xf32, #tpu.memory_space<smem>>
    %c13 = arith.constant 13 : index
    %13 = memref.load %arg1[%c13] : memref<27xf32, #tpu.memory_space<smem>>
    %c12 = arith.constant 12 : index
    %14 = memref.load %arg1[%c12] : memref<27xf32, #tpu.memory_space<smem>>
    %c11 = arith.constant 11 : index
    %15 = memref.load %arg1[%c11] : memref<27xf32, #tpu.memory_space<smem>>
    %c10 = arith.constant 10 : index
    %16 = memref.load %arg1[%c10] : memref<27xf32, #tpu.memory_space<smem>>
    %c9 = arith.constant 9 : index
    %17 = memref.load %arg1[%c9] : memref<27xf32, #tpu.memory_space<smem>>
    %c26 = arith.constant 26 : index
    %18 = memref.load %arg1[%c26] : memref<27xf32, #tpu.memory_space<smem>>
    %c25 = arith.constant 25 : index
    %19 = memref.load %arg1[%c25] : memref<27xf32, #tpu.memory_space<smem>>
    %c24 = arith.constant 24 : index
    %20 = memref.load %arg1[%c24] : memref<27xf32, #tpu.memory_space<smem>>
    %c23 = arith.constant 23 : index
    %21 = memref.load %arg1[%c23] : memref<27xf32, #tpu.memory_space<smem>>
    %c22 = arith.constant 22 : index
    %22 = memref.load %arg1[%c22] : memref<27xf32, #tpu.memory_space<smem>>
    %c21 = arith.constant 21 : index
    %23 = memref.load %arg1[%c21] : memref<27xf32, #tpu.memory_space<smem>>
    %c20 = arith.constant 20 : index
    %24 = memref.load %arg1[%c20] : memref<27xf32, #tpu.memory_space<smem>>
    %c19 = arith.constant 19 : index
    %25 = memref.load %arg1[%c19] : memref<27xf32, #tpu.memory_space<smem>>
    %c18 = arith.constant 18 : index
    %26 = memref.load %arg1[%c18] : memref<27xf32, #tpu.memory_space<smem>>
    %c0_0 = arith.constant 0 : index
    %c0_1 = arith.constant 0 : index
    %c0_2 = arith.constant 0 : index
    %27 = vector.load %arg0[%c0_0, %c0_1, %c0_2] : memref<2x9x8xf32, #tpu.memory_space<vmem>>, vector<2x7x6xf32>
    %c0_3 = arith.constant 0 : index
    %c0_4 = arith.constant 0 : index
    %c1_5 = arith.constant 1 : index
    %28 = vector.load %arg0[%c0_3, %c0_4, %c1_5] : memref<2x9x8xf32, #tpu.memory_space<vmem>>, vector<2x7x6xf32>
    %c0_6 = arith.constant 0 : index
    %c0_7 = arith.constant 0 : index
    %c2_8 = arith.constant 2 : index
    %29 = vector.load %arg0[%c0_6, %c0_7, %c2_8] : memref<2x9x8xf32, #tpu.memory_space<vmem>>, vector<2x7x6xf32>
    %c0_9 = arith.constant 0 : index
    %c1_10 = arith.constant 1 : index
    %c0_11 = arith.constant 0 : index
    %30 = vector.load %arg0[%c0_9, %c1_10, %c0_11] : memref<2x9x8xf32, #tpu.memory_space<vmem>>, vector<2x7x6xf32>
    %c0_12 = arith.constant 0 : index
    %c1_13 = arith.constant 1 : index
    %c1_14 = arith.constant 1 : index
    %31 = vector.load %arg0[%c0_12, %c1_13, %c1_14] : memref<2x9x8xf32, #tpu.memory_space<vmem>>, vector<2x7x6xf32>
    %c0_15 = arith.constant 0 : index
    %c1_16 = arith.constant 1 : index
    %c2_17 = arith.constant 2 : index
    %32 = vector.load %arg0[%c0_15, %c1_16, %c2_17] : memref<2x9x8xf32, #tpu.memory_space<vmem>>, vector<2x7x6xf32>
    %c0_18 = arith.constant 0 : index
    %c2_19 = arith.constant 2 : index
    %c0_20 = arith.constant 0 : index
    %33 = vector.load %arg0[%c0_18, %c2_19, %c0_20] : memref<2x9x8xf32, #tpu.memory_space<vmem>>, vector<2x7x6xf32>
    %c0_21 = arith.constant 0 : index
    %c2_22 = arith.constant 2 : index
    %c1_23 = arith.constant 1 : index
    %34 = vector.load %arg0[%c0_21, %c2_22, %c1_23] : memref<2x9x8xf32, #tpu.memory_space<vmem>>, vector<2x7x6xf32>
    %c0_24 = arith.constant 0 : index
    %c2_25 = arith.constant 2 : index
    %c2_26 = arith.constant 2 : index
    %35 = vector.load %arg0[%c0_24, %c2_25, %c2_26] : memref<2x9x8xf32, #tpu.memory_space<vmem>>, vector<2x7x6xf32>
    %36 = vector.broadcast %0 : f32 to vector<2x7x6xf32>
    %37 = arith.mulf %27, %36 : vector<2x7x6xf32>
    %38 = vector.broadcast %1 : f32 to vector<2x7x6xf32>
    %39 = arith.mulf %28, %38 : vector<2x7x6xf32>
    %40 = arith.addf %37, %39 : vector<2x7x6xf32>
    %41 = vector.broadcast %2 : f32 to vector<2x7x6xf32>
    %42 = arith.mulf %29, %41 : vector<2x7x6xf32>
    %43 = arith.addf %40, %42 : vector<2x7x6xf32>
    %44 = vector.broadcast %3 : f32 to vector<2x7x6xf32>
    %45 = arith.mulf %30, %44 : vector<2x7x6xf32>
    %46 = arith.addf %43, %45 : vector<2x7x6xf32>
    %47 = vector.broadcast %4 : f32 to vector<2x7x6xf32>
    %48 = arith.mulf %31, %47 : vector<2x7x6xf32>
    %49 = arith.addf %46, %48 : vector<2x7x6xf32>
    %50 = vector.broadcast %5 : f32 to vector<2x7x6xf32>
    %51 = arith.mulf %32, %50 : vector<2x7x6xf32>
    %52 = arith.addf %49, %51 : vector<2x7x6xf32>
    %53 = vector.broadcast %6 : f32 to vector<2x7x6xf32>
    %54 = arith.mulf %33, %53 : vector<2x7x6xf32>
    %55 = arith.addf %52, %54 : vector<2x7x6xf32>
    %56 = vector.broadcast %7 : f32 to vector<2x7x6xf32>
    %57 = arith.mulf %34, %56 : vector<2x7x6xf32>
    %58 = arith.addf %55, %57 : vector<2x7x6xf32>
    %59 = vector.broadcast %8 : f32 to vector<2x7x6xf32>
    %60 = arith.mulf %35, %59 : vector<2x7x6xf32>
    %61 = arith.addf %58, %60 : vector<2x7x6xf32>
    %cst = arith.constant 0.000000e+00 : f32
    %62 = vector.broadcast %cst : f32 to vector<2x7x6xf32>
    %63 = arith.cmpf ogt, %61, %62 : vector<2x7x6xf32>
    %cst_27 = arith.constant -1.403000e+00 : f32
    %64 = vector.broadcast %cst_27 : f32 to vector<2x7x6xf32>
    %65 = arith.mulf %61, %64 : vector<2x7x6xf32>
    %66 = arith.select %63, %61, %65 : vector<2x7x6xi1>, vector<2x7x6xf32>
    %c0_28 = arith.constant 0 : index
    %c0_29 = arith.constant 0 : index
    %c0_30 = arith.constant 0 : index
    %c0_31 = arith.constant 0 : index
    %67 = vector.load %arg2[%c0_28, %c0_29, %c0_30, %c0_31] : memref<2x3x7x6xf32, #tpu.memory_space<vmem>>, vector<2x1x7x6xf32>
    %68 = vector.shape_cast %67 : vector<2x1x7x6xf32> to vector<2x7x6xf32>
    %69 = vector.shape_cast %66 : vector<2x7x6xf32> to vector<2x1x7x6xf32>
    tpu.vector_store %arg2[%c0_28, %c0_29, %c0_30, %c0_31], %69 {strides = array<i32>} : memref<2x3x7x6xf32, #tpu.memory_space<vmem>>, vector<2x1x7x6xf32>,
    %70 = vector.broadcast %9 : f32 to vector<2x7x6xf32>
    %71 = arith.mulf %27, %70 : vector<2x7x6xf32>
    %72 = vector.broadcast %10 : f32 to vector<2x7x6xf32>
    %73 = arith.mulf %28, %72 : vector<2x7x6xf32>
    %74 = arith.addf %71, %73 : vector<2x7x6xf32>
    %75 = vector.broadcast %11 : f32 to vector<2x7x6xf32>
    %76 = arith.mulf %29, %75 : vector<2x7x6xf32>
    %77 = arith.addf %74, %76 : vector<2x7x6xf32>
    %78 = vector.broadcast %12 : f32 to vector<2x7x6xf32>
    %79 = arith.mulf %30, %78 : vector<2x7x6xf32>
    %80 = arith.addf %77, %79 : vector<2x7x6xf32>
    %81 = vector.broadcast %13 : f32 to vector<2x7x6xf32>
    %82 = arith.mulf %31, %81 : vector<2x7x6xf32>
    %83 = arith.addf %80, %82 : vector<2x7x6xf32>
    %84 = vector.broadcast %14 : f32 to vector<2x7x6xf32>
    %85 = arith.mulf %32, %84 : vector<2x7x6xf32>
    %86 = arith.addf %83, %85 : vector<2x7x6xf32>
    %87 = vector.broadcast %15 : f32 to vector<2x7x6xf32>
    %88 = arith.mulf %33, %87 : vector<2x7x6xf32>
    %89 = arith.addf %86, %88 : vector<2x7x6xf32>
    %90 = vector.broadcast %16 : f32 to vector<2x7x6xf32>
    %91 = arith.mulf %34, %90 : vector<2x7x6xf32>
    %92 = arith.addf %89, %91 : vector<2x7x6xf32>
    %93 = vector.broadcast %17 : f32 to vector<2x7x6xf32>
    %94 = arith.mulf %35, %93 : vector<2x7x6xf32>
    %95 = arith.addf %92, %94 : vector<2x7x6xf32>
    %cst_32 = arith.constant 0.000000e+00 : f32
    %96 = vector.broadcast %cst_32 : f32 to vector<2x7x6xf32>
    %97 = arith.cmpf ogt, %95, %96 : vector<2x7x6xf32>
    %cst_33 = arith.constant -1.403000e+00 : f32
    %98 = vector.broadcast %cst_33 : f32 to vector<2x7x6xf32>
    %99 = arith.mulf %95, %98 : vector<2x7x6xf32>
    %100 = arith.select %97, %95, %99 : vector<2x7x6xi1>, vector<2x7x6xf32>
    %c0_34 = arith.constant 0 : index
    %c1_35 = arith.constant 1 : index
    %c0_36 = arith.constant 0 : index
    %c0_37 = arith.constant 0 : index
    %101 = vector.load %arg2[%c0_34, %c1_35, %c0_36, %c0_37] : memref<2x3x7x6xf32, #tpu.memory_space<vmem>>, vector<2x1x7x6xf32>
    %102 = vector.shape_cast %101 : vector<2x1x7x6xf32> to vector<2x7x6xf32>
    %103 = vector.shape_cast %100 : vector<2x7x6xf32> to vector<2x1x7x6xf32>
    tpu.vector_store %arg2[%c0_34, %c1_35, %c0_36, %c0_37], %103 {strides = array<i32>} : memref<2x3x7x6xf32, #tpu.memory_space<vmem>>, vector<2x1x7x6xf32>,
    %104 = vector.broadcast %18 : f32 to vector<2x7x6xf32>
    %105 = arith.mulf %27, %104 : vector<2x7x6xf32>
    %106 = vector.broadcast %19 : f32 to vector<2x7x6xf32>
    %107 = arith.mulf %28, %106 : vector<2x7x6xf32>
    %108 = arith.addf %105, %107 : vector<2x7x6xf32>
    %109 = vector.broadcast %20 : f32 to vector<2x7x6xf32>
    %110 = arith.mulf %29, %109 : vector<2x7x6xf32>
    %111 = arith.addf %108, %110 : vector<2x7x6xf32>
    %112 = vector.broadcast %21 : f32 to vector<2x7x6xf32>
    %113 = arith.mulf %30, %112 : vector<2x7x6xf32>
    %114 = arith.addf %111, %113 : vector<2x7x6xf32>
    %115 = vector.broadcast %22 : f32 to vector<2x7x6xf32>
    %116 = arith.mulf %31, %115 : vector<2x7x6xf32>
    %117 = arith.addf %114, %116 : vector<2x7x6xf32>
    %118 = vector.broadcast %23 : f32 to vector<2x7x6xf32>
    %119 = arith.mulf %32, %118 : vector<2x7x6xf32>
    %120 = arith.addf %117, %119 : vector<2x7x6xf32>
    %121 = vector.broadcast %24 : f32 to vector<2x7x6xf32>
    %122 = arith.mulf %33, %121 : vector<2x7x6xf32>
    %123 = arith.addf %120, %122 : vector<2x7x6xf32>
    %124 = vector.broadcast %25 : f32 to vector<2x7x6xf32>
    %125 = arith.mulf %34, %124 : vector<2x7x6xf32>
    %126 = arith.addf %123, %125 : vector<2x7x6xf32>
    %127 = vector.broadcast %26 : f32 to vector<2x7x6xf32>
    %128 = arith.mulf %35, %127 : vector<2x7x6xf32>
    %129 = arith.addf %126, %128 : vector<2x7x6xf32>
    %cst_38 = arith.constant 0.000000e+00 : f32
    %130 = vector.broadcast %cst_38 : f32 to vector<2x7x6xf32>
    %131 = arith.cmpf ogt, %129, %130 : vector<2x7x6xf32>
    %cst_39 = arith.constant -1.403000e+00 : f32
    %132 = vector.broadcast %cst_39 : f32 to vector<2x7x6xf32>
    %133 = arith.mulf %129, %132 : vector<2x7x6xf32>
    %134 = arith.select %131, %129, %133 : vector<2x7x6xi1>, vector<2x7x6xf32>
    %c0_40 = arith.constant 0 : index
    %c2_41 = arith.constant 2 : index
    %c0_42 = arith.constant 0 : index
    %c0_43 = arith.constant 0 : index
    %135 = vector.load %arg2[%c0_40, %c2_41, %c0_42, %c0_43] : memref<2x3x7x6xf32, #tpu.memory_space<vmem>>, vector<2x1x7x6xf32>
    %136 = vector.shape_cast %135 : vector<2x1x7x6xf32> to vector<2x7x6xf32>
    %137 = vector.shape_cast %134 : vector<2x7x6xf32> to vector<2x1x7x6xf32>
    tpu.vector_store %arg2[%c0_40, %c2_41, %c0_42, %c0_43], %137 {strides = array<i32>} : memref<2x3x7x6xf32, #tpu.memory_space<vmem>>, vector<2x1x7x6xf32>,
    return
  }
}

</mosaic_0001>

<bundles_post_ra>
// kernel: tpu_custom_call.1
= control target key start
LH: loop header
LB: loop body
LE: loop exit
PB: predicated region body
PF: predicated region fallthrough
CT: control target
= control target key end

     0   :  { %7 = vsyncpa [#allocation3], 0  ;;  %s409_s12 = smov [#allocation2]   ;;  %s586_s0 = inlined_call_operand.vmem [shape: f32[2,9,8], index: 0, kind: input, shape index: {}]   ;;  %s587_s1 = inlined_call_operand.vmem [shape: f32[27], index: 1, kind: input, shape index: {}]   ;;  %s588_s2 = inlined_call_operand.vmem [shape: f32[2,3,7,6], index: 2, kind: output, shape index: {}]  }
   0x1   :  { %s15_s11 = sshll.u32 %s587_s1, 4  ;;  %s16_s11 = int_to_ptr.vmem [resolvable:$true] %s15_s11 }
   0x2   :  { %18 = dma.vmem_to_smem %s16_s11, 16, %s409_s12, [#allocation3]  }
   0x3   :  { %407 = dma.done.wait [#allocation3], 16  }
   0x4   :  { %408 = vsyncadd [#allocation3], 4294967280 }
   0x5   :  { %23 = sfence }
   0x6   :  { %s364_s13 = sld [smem:[#allocation2 + $0x6]]  ;;  %v433_v0 = vld [vmem:[%s586_s0] sm:$0x7f]  ;;  %s410_s1 = smov 126   ;;  %v446_v7 = vld [vmem:[%s586_s0 + $0x10] sm:$0x7f] }
   0x7   :  { %s363_s14 = sld [smem:[#allocation2 + $0x7]]  ;;  %v441_v5 = vld [vmem:[%s586_s0 + $0x1] sm:$0x7f]  ;;  %s411_s22 = smov 127   ;;  %v456_v11 = vld [vmem:[%s586_s0 + $0x11] sm:$0x7f] }
   0x8   :  { %s366_s15 = sld [smem:[#allocation2 + $0x4]]  ;;  %v467_v16 = vld [vmem:[%s586_s0 + $0x2] sm:$0x7f]  ;;  %v475_v20 = vld [vmem:[%s586_s0 + $0x12] sm:$0x7f]  ;;  %vm154_vm0 = vcmask 47104  }
   0x9   :  { %s367_s23 = sld [smem:[#allocation2 + $0x3]] }
   0xa   :  { %s369_s26 = sld [smem:[#allocation2 + $0x1]] }
   0xb   :  { %s32_s27 = sld [smem:[#allocation2]] }
   0xc   :  { %v73_v1 = vstv %s364_s13  ;;  %s371_s30 = sld [smem:[#allocation2 + $0x10]] }
   0xd   :  { %v74_v2 = vmul.f32 %v73_v1, %v433_v0  ;;  %v60_v3 = vstv %s363_s14  ;;  %v75_v9 = vmul.f32 %v73_v1, %v446_v7  ;;  %s372_s5 = sld [smem:[#allocation2 + $0xf]] }
   0xe   :  { %v61_v4 = vmul.f32 %v60_v3, %v433_v0  ;;  %v91_v6 = vstv %s366_s15  ;;  %v62_v10 = vmul.f32 %v60_v3, %v446_v7  ;;  %s374_s6 = sld [smem:[#allocation2 + $0xd]] }
   0xf   :  { %78 = vrot.lane.b32.xlu1 %v74_v2, %s410_s1  ;;  %v92_v8 = vmul.f32 %v91_v6, %v441_v5  ;;  %v93_v12 = vmul.f32 %v91_v6, %v456_v11  ;;  %v104_v13 = vstv %s367_s23  ;;  %s380_s0 = sld [smem:[#allocation2 + $0x19]] }
  0x10   :  { %65 = vrot.lane.b32.xlu0 %v61_v4, %s411_s22  ;;  %v106_v14 = vmul.f32 %v104_v13, %v456_v11  ;;  %v105_v15 = vmul.f32 %v104_v13, %v441_v5  ;;  %v122_v17 = vstv %s369_s26  ;;  %s381_s7 = sld [smem:[#allocation2 + $0x18]] }
  0x11   :  { %96 = vrot.lane.b32.xlu2 %v92_v8, %s411_s22  ;;  %v123_v18 = vmul.f32 %v122_v17, %v467_v16  ;;  %v135_v19 = vstv %s32_s27  ;;  %v124_v22 = vmul.f32 %v122_v17, %v475_v20  ;;  %s383_s8 = sld [smem:[#allocation2 + $0x16]] }
  0x12   :  { %v136_v21 = vmul.f32 %v135_v19, %v467_v16  ;;  %v137_v23 = vmul.f32 %v135_v19, %v475_v20  ;;  %v160_v24 = vstv %s371_s30  ;;  %s375_s9 = sld [smem:[#allocation2 + $0xc]] }
  0x13   :  { %v162_v25 = vmul.f32 %v160_v24, %v446_v7  ;;  %v161_v26 = vmul.f32 %v160_v24, %v433_v0  ;;  %v173_v27 = vstv %s372_s5  ;;  %s384_s10 = sld [smem:[#allocation2 + $0x15]] }
  0x14   :  { %v174_v28 = vmul.f32 %v173_v27, %v433_v0  ;;  %v191_v29 = vstv %s374_s6  ;;  %v175_v31 = vmul.f32 %v173_v27, %v446_v7  ;;  %s377_s11 = sld [smem:[#allocation2 + $0xa]] }
  0x15   :  { %v192_v30 = vmul.f32 %v191_v29, %v441_v5  ;;  %v260_v32 = vstv %s380_s0  ;;  %v193_v40 = vmul.f32 %v191_v29, %v456_v11  ;;  %s386_s12 = sld [smem:[#allocation2 + $0x13]] }
  0x16   :  { %v261_v33 = vmul.f32 %v260_v32, %v433_v0  ;;  %v273_v34 = vstv %s381_s7  ;;  %v262_v36 = vmul.f32 %v260_v32, %v446_v7  ;;  %s378_s13 = sld [smem:[#allocation2 + $0x9]] }
  0x17   :  { %80 = vrot.lane.b32.xlu1 %v75_v9, %s410_s1  ;;  %v274_v35 = vmul.f32 %v273_v34, %v433_v0  ;;  %v275_v37 = vmul.f32 %v273_v34, %v446_v7  ;;  %v291_v38 = vstv %s383_s8  ;;  %s387_s14 = sld [smem:[#allocation2 + $0x12]] }
  0x18   :  { %67 = vrot.lane.b32.xlu0 %v62_v10, %s411_s22  ;;  %v292_v39 = vmul.f32 %v291_v38, %v441_v5  ;;  %v293_v41 = vmul.f32 %v291_v38, %v456_v11  ;;  %v204_v42 = vstv %s375_s9  ;;  %s362_s15 = sld [smem:[#allocation2 + $0x8]] }
  0x19   :  { %98 = vrot.lane.b32.xlu2 %v93_v12, %s411_s22  ;;  %v206_v43 = vmul.f32 %v204_v42, %v456_v11  ;;  %v205_v44 = vmul.f32 %v204_v42, %v441_v5  ;;  %v304_v45 = vstv %s384_s10  ;;  %s365_s16 = sld [smem:[#allocation2 + $0x5]] }
  0x1a   :  { %v305_v46 = vmul.f32 %v304_v45, %v441_v5  ;;  %v222_v47 = vstv %s377_s11  ;;  %v306_v49 = vmul.f32 %v304_v45, %v456_v11  ;;  %s368_s17 = sld [smem:[#allocation2 + $0x2]] }
  0x1b   :  { %v223_v48 = vmul.f32 %v222_v47, %v467_v16  ;;  %v224_v50 = vmul.f32 %v222_v47, %v475_v20  ;;  %v322_v51 = vstv %s386_s12  ;;  %s546_s21 = sld [smem:[#allocation2 + $0x11]] }
  0x1c   :  { %v324_v52 = vmul.f32 %v322_v51, %v475_v20  ;;  %v323_v53 = vmul.f32 %v322_v51, %v467_v16  ;;  %v235_v54 = vstv %s378_s13  ;;  %s379_s23 = sld [smem:[#allocation2 + $0x1a]] }
  0x1d   :  { %v236_v55 = vmul.f32 %v235_v54, %v467_v16  ;;  %v335_v56 = vstv %s387_s14  ;;  %v237_v58 = vmul.f32 %v235_v54, %v475_v20  ;;  %s382_s24 = sld [smem:[#allocation2 + $0x17]] }
  0x1e   :  { %v336_v57 = vmul.f32 %v335_v56, %v467_v16  ;;  %v337_v59 = vmul.f32 %v335_v56, %v475_v20  ;;  %v57_v63 = vstv %s362_s15  ;;  %s553_s25 = sld [smem:[#allocation2 + $0xb]] }
  0x1f   :  { %111 = vrot.lane.b32.xlu1 %v106_v14, %s410_s1  ;;  %v58_v2 = vmul.f32 %v57_v63, %v433_v0  ;;  %v86_v8 = vstv %s365_s16  ;;  %v59_v9 = vmul.f32 %v57_v63, %v446_v7  ;;  %s561_s26 = sld [smem:[#allocation2 + $0x14]] }
  0x20   :  { %109 = vrot.lane.b32.xlu0 %v105_v15, %s410_s1  ;;  %v87_v13 = vmul.f32 %v86_v8, %v441_v5  ;;  %v88_v17 = vmul.f32 %v86_v8, %v456_v11 }
  0x21   :  { %127 = vrot.lane.b32.xlu2 %v123_v18, %s411_s22  ;;  %v157_v51 = vstv %s546_s21 }
  0x24   :  { %v217_v8 = vstv %s553_s25 }
  0x27   :  { %140 = vrot.lane.b32.xlu1 %v136_v21, %s410_s1 }
  0x28   :  { %129 = vrot.lane.b32.xlu0 %v124_v22, %s411_s22  ;;  %v117_v22 = vstv %s368_s17 }
  0x29   :  { %142 = vrot.lane.b32.xlu2 %v137_v23, %s410_s1  ;;  %v119_v32 = vmul.f32 %v117_v22, %v475_v20 }
  0x2f   :  { %167 = vrot.lane.b32.xlu1 %v162_v25, %s411_s22 }
  0x30   :  { %165 = vrot.lane.b32.xlu0 %v161_v26, %s411_s22  ;;  %v118_v26 = vmul.f32 %v117_v22, %v467_v16 }
  0x31   :  { %178 = vrot.lane.b32.xlu2 %v174_v28, %s410_s1 }
  0x37   :  { %196 = vrot.lane.b32.xlu1 %v192_v30, %s411_s22 }
  0x38   :  { %180 = vrot.lane.b32.xlu0 %v175_v31, %s410_s1 }
  0x39   :  { %265 = vrot.lane.b32.xlu2 %v261_v33, %s411_s22 }
  0x3f   :  { %278 = vrot.lane.b32.xlu1 %v274_v35, %s410_s1 }
  0x40   :  { %267 = vrot.lane.b32.xlu0 %v262_v36, %s411_s22 }
  0x41   :  { %280 = vrot.lane.b32.xlu2 %v275_v37, %s410_s1 }
  0x47   :  { %296 = vrot.lane.b32.xlu1 %v292_v39, %s411_s22 }
  0x48   :  { %198 = vrot.lane.b32.xlu0 %v193_v40, %s411_s22 }
  0x49   :  { %298 = vrot.lane.b32.xlu2 %v293_v41, %s411_s22 }
  0x4f   :  { %211 = vrot.lane.b32.xlu1 %v206_v43, %s410_s1 }
  0x50   :  { %209 = vrot.lane.b32.xlu0 %v205_v44, %s410_s1 }
  0x51   :  { %309 = vrot.lane.b32.xlu2 %v305_v46, %s410_s1 }
  0x57   :  { %227 = vrot.lane.b32.xlu1 %v223_v48, %s411_s22 }
  0x58   :  { %311 = vrot.lane.b32.xlu0 %v306_v49, %s410_s1 }
  0x59   :  { %229 = vrot.lane.b32.xlu2 %v224_v50, %s411_s22 }
  0x5f   :  { %329 = vrot.lane.b32.xlu1 %v324_v52, %s411_s22 }
  0x60   :  { %327 = vrot.lane.b32.xlu0 %v323_v53, %s411_s22  ;;  %s548_s22 = sld [smem:[#allocation2 + $0xe]] }
  0x61   :  { %240 = vrot.lane.b32.xlu2 %v236_v55, %s410_s1  ;;  %v158_v55 = vmul.f32 %v157_v51, %v433_v0 }
  0x67   :  { %340 = vrot.lane.b32.xlu1 %v336_v57, %s410_s1  ;;  %v257_v57 = vstv %s379_s23 }
  0x68   :  { %242 = vrot.lane.b32.xlu0 %v237_v58, %s410_s1  ;;  %v186_v58 = vstv %s548_s22 }
  0x69   :  { %342 = vrot.lane.b32.xlu2 %v337_v59, %s410_s1  ;;  %v187_v63 = vmul.f32 %v186_v58, %v441_v5 }
  0x6b   :  { %v97_v60 = vpop.permute.xlu2 %96 }
  0x73   :  { %v99_v61 = vpop.permute.xlu2 %98 }
  0x7b   :  { %v128_v62 = vpop.permute.xlu2 %127 }
  0x81   :  { %v79_v1 = vpop.permute.xlu1 %78 }
  0x82   :  { %v66_v3 = vpop.permute.xlu0 %65 }
  0x83   :  { %v143_v4 = vpop.permute.xlu2 %142  ;;  %v71_v6 = vadd.f32 %v66_v3, %v58_v2 }
  0x85   :  { %v84_v10 = vadd.f32 %v79_v1, %v71_v6 }
  0x87   :  { %v89_v21 = vadd.f32 %v87_v13, %v84_v10 }
  0x89   :  { %v81_v12 = vpop.permute.xlu1 %80  ;;  %v102_v27 = vadd.f32 %v97_v60, %v89_v21  ;;  %v259_v60 = vmul.f32 %v257_v57, %v446_v7 }
  0x8a   :  { %v68_v14 = vpop.permute.xlu0 %67 }
  0x8b   :  { %v72_v15 = vadd.f32 %v68_v14, %v59_v9  ;;  %v179_v18 = vpop.permute.xlu2 %178  ;;  %v258_v9 = vmul.f32 %v257_v57, %v433_v0 }
  0x8d   :  { %v85_v19 = vadd.f32 %v81_v12, %v72_v15  ;;  %v159_v15 = vmul.f32 %v157_v51, %v446_v7 }
  0x8f   :  { %v90_v23 = vadd.f32 %v88_v17, %v85_v19 }
  0x91   :  { %v112_v24 = vpop.permute.xlu1 %111  ;;  %v103_v25 = vadd.f32 %v99_v61, %v90_v23 }
  0x92   :  { %v110_v28 = vpop.permute.xlu0 %109 }
  0x93   :  { %v115_v29 = vadd.f32 %v110_v28, %v102_v27  ;;  %v116_v30 = vadd.f32 %v112_v24, %v103_v25  ;;  %v266_v33 = vpop.permute.xlu2 %265  ;;  %v188_v27 = vmul.f32 %v186_v58, %v456_v11 }
  0x94   :  { %v271_v19 = vadd.f32 %v266_v33, %v258_v9 }
  0x95   :  { %v120_v31 = vadd.f32 %v118_v26, %v115_v29  ;;  %v121_v36 = vadd.f32 %v119_v32, %v116_v30 }
  0x97   :  { %v133_v34 = vadd.f32 %v128_v62, %v120_v31  ;;  %v317_v31 = vstv %s561_s26 }
  0x98   :  { %v319_v33 = vmul.f32 %v317_v31, %v475_v20 }
  0x99   :  { %v141_v35 = vpop.permute.xlu1 %140 }
  0x9a   :  { %v146_v37 = vadd.f32 %v141_v35, %v133_v34  ;;  %v130_v38 = vpop.permute.xlu0 %129 }
  0x9b   :  { %v134_v39 = vadd.f32 %v130_v38, %v121_v36  ;;  %v281_v44 = vpop.permute.xlu2 %280 }
  0x9c   :  { %vm148_vm1 = vcmp.gt.f32.partialorder %v146_v37, 0.0  ;;  %v150_v40 = vmul.f32 -1.403, %v146_v37 }
  0x9d   :  { %v147_v41 = vadd.f32 %v143_v4, %v134_v39  ;;  %v286_v4 = vstv %s382_s24 }
  0x9e   :  { %v152_v42 = vsel %vm148_vm1, %v146_v37, %v150_v40  ;;  %v288_v13 = vmul.f32 %v286_v4, %v456_v11  ;;  %v287_v0 = vmul.f32 %v286_v4, %v441_v5  ;;  %v219_v11 = vmul.f32 %v217_v8, %v475_v20 }
  0x9f   :  { %155 = vst.msk [vmem:[%s588_s2] sm:$0x7f] %vm154_vm0, %v152_v42  ;;  %vm149_vm2 = vcmp.gt.f32.partialorder %v147_v41, 0.0  ;;  %v151_v43 = vmul.f32 -1.403, %v147_v41 }
  0xa1   :  { %v153_v45 = vsel %vm149_vm2, %v147_v41, %v151_v43  ;;  %v168_v46 = vpop.permute.xlu1 %167 }
  0xa2   :  { %156 = vst.msk [vmem:[%s588_s2 + $0x18] sm:$0x7f] %vm154_vm0, %v153_v45  ;;  %v166_v47 = vpop.permute.xlu0 %165  ;;  %v172_v22 = vadd.f32 %v168_v46, %v159_v15  ;;  %v318_v46 = vmul.f32 %v317_v31, %v467_v16 }
  0xa3   :  { %v299_v49 = vpop.permute.xlu2 %298  ;;  %v171_v56 = vadd.f32 %v166_v47, %v158_v55 }
  0xa5   :  { %v184_v62 = vadd.f32 %v179_v18, %v171_v56  ;;  %v218_v18 = vmul.f32 %v217_v8, %v467_v16 }
  0xa7   :  { %v189_v3 = vadd.f32 %v187_v63, %v184_v62 }
  0xa9   :  { %v197_v48 = vpop.permute.xlu1 %196 }
  0xaa   :  { %v181_v50 = vpop.permute.xlu0 %180  ;;  %v202_v10 = vadd.f32 %v197_v48, %v189_v3 }
  0xab   :  { %v310_v54 = vpop.permute.xlu2 %309  ;;  %v185_v26 = vadd.f32 %v181_v50, %v172_v22 }
  0xad   :  { %v190_v36 = vadd.f32 %v188_v27, %v185_v26 }
  0xb1   :  { %v279_v52 = vpop.permute.xlu1 %278 }
  0xb2   :  { %v268_v53 = vpop.permute.xlu0 %267  ;;  %v284_v24 = vadd.f32 %v279_v52, %v271_v19 }
  0xb3   :  { %v230_v1 = vpop.permute.xlu2 %229  ;;  %v272_v2 = vadd.f32 %v268_v53, %v259_v60 }
  0xb4   :  { %v289_v32 = vadd.f32 %v287_v0, %v284_v24 }
  0xb5   :  { %v285_v12 = vadd.f32 %v281_v44, %v272_v2 }
  0xb7   :  { %v290_v21 = vadd.f32 %v288_v13, %v285_v12 }
  0xb9   :  { %v297_v59 = vpop.permute.xlu1 %296  ;;  %v303_v29 = vadd.f32 %v299_v49, %v290_v21 }
  0xba   :  { %v199_v61 = vpop.permute.xlu0 %198  ;;  %v302_v37 = vadd.f32 %v297_v59, %v289_v32 }
  0xbb   :  { %v241_v23 = vpop.permute.xlu2 %240  ;;  %v203_v39 = vadd.f32 %v199_v61, %v190_v36 }
  0xbc   :  { %v315_v44 = vadd.f32 %v310_v54, %v302_v37 }
  0xbe   :  { %v320_v50 = vadd.f32 %v318_v46, %v315_v44 }
  0xc1   :  { %v212_v6 = vpop.permute.xlu1 %211 }
  0xc2   :  { %v210_v14 = vpop.permute.xlu0 %209  ;;  %v216_v41 = vadd.f32 %v212_v6, %v203_v39 }
  0xc3   :  { %v215_v17 = vadd.f32 %v210_v14, %v202_v10  ;;  %v343_v43 = vpop.permute.xlu2 %342 }
  0xc4   :  { %v221_v49 = vadd.f32 %v219_v11, %v216_v41 }
  0xc5   :  { %v220_v25 = vadd.f32 %v218_v18, %v215_v17 }
  0xc6   :  { %v234_v20 = vadd.f32 %v230_v1, %v221_v49 }
  0xc9   :  { %v228_v28 = vpop.permute.xlu1 %227 }
  0xca   :  { %v233_v7 = vadd.f32 %v228_v28, %v220_v25  ;;  %v312_v30 = vpop.permute.xlu0 %311 }
  0xcb   :  { %v316_v34 = vadd.f32 %v312_v30, %v303_v29 }
  0xcc   :  { %v246_v35 = vadd.f32 %v241_v23, %v233_v7 }
  0xcd   :  { %v321_v40 = vadd.f32 %v319_v33, %v316_v34 }
  0xce   :  { %vm248_vm3 = vcmp.gt.f32.partialorder %v246_v35, 0.0  ;;  %v250_v38 = vmul.f32 -1.403, %v246_v35 }
  0xd0   :  { %v252_v5 = vsel %vm248_vm3, %v246_v35, %v250_v38 }
  0xd1   :  { %388 = vst.msk [vmem:[%s588_s2 + $0x8] sm:$0x7f] %vm154_vm0, %v252_v5  ;;  %v330_v42 = vpop.permute.xlu1 %329 }
  0xd2   :  { %v334_v45 = vadd.f32 %v330_v42, %v321_v40  ;;  %v328_v47 = vpop.permute.xlu0 %327 }
  0xd3   :  { %v333_v52 = vadd.f32 %v328_v47, %v320_v50 }
  0xd4   :  { %v347_v48 = vadd.f32 %v343_v43, %v334_v45 }
  0xd6   :  { %vm349_vm4 = vcmp.gt.f32.partialorder %v347_v48, 0.0  ;;  %v351_v51 = vmul.f32 -1.403, %v347_v48 }
  0xd8   :  { %v353_v53 = vsel %vm349_vm4, %v347_v48, %v351_v51 }
  0xd9   :  { %391 = vst.msk [vmem:[%s588_s2 + $0x28] sm:$0x7f] %vm154_vm0, %v353_v53  ;;  %v341_v55 = vpop.permute.xlu1 %340 }
  0xda   :  { %v346_v56 = vadd.f32 %v341_v55, %v333_v52  ;;  %v243_v54 = vpop.permute.xlu0 %242 }
  0xdb   :  { %v247_v57 = vadd.f32 %v243_v54, %v234_v20 }
  0xdc   :  { %vm348_vm5 = vcmp.gt.f32.partialorder %v346_v56, 0.0  ;;  %v350_v16 = vmul.f32 -1.403, %v346_v56 }
  0xdd   :  { %vm249_vm6 = vcmp.gt.f32.partialorder %v247_v57, 0.0  ;;  %v251_v58 = vmul.f32 -1.403, %v247_v57 }
  0xde   :  { %v352_v59 = vsel %vm348_vm5, %v346_v56, %v350_v16 }
  0xdf   :  { %390 = vst.msk [vmem:[%s588_s2 + $0x10] sm:$0x7f] %vm154_vm0, %v352_v59  ;;  %v253_v60 = vsel %vm249_vm6, %v247_v57, %v251_v58 }
  0xe0   :  { %389 = vst.msk [vmem:[%s588_s2 + $0x20] sm:$0x7f] %vm154_vm0, %v253_v60 }
  0xe1   :  { %361 = vsyncpa [#allocation3], 1 }

</bundles_post_ra>
